<compile_context>
chip_gen: v7x
topology: tpu7x:2x2x1
jax: 0.10.0
libtpu: 0.0.40
codegen_flags: <defaults>
</compile_context>

<pallas_src>
import jax
import jax.numpy as jnp
from jax import lax
from jax.experimental import pallas as pl
from jax.experimental.pallas import tpu as pltpu

_IN, _HID1, _HID2, _OUT = 5, 128, 32, 2
_PCOLS = 4                       # packed per-channel shift columns
_VMEM_CAP_BYTES = 48 * 1024 * 1024  # safe headroom on v7x (64 MiB/TC) & v5e/v6e


def _mlp_kernel(x_ref, w1_ref, w2_ref, w3_ref, w4_ref, p_ref, o_ref):
    """Fused fc1->bn1->relu -> fc2->bn2->relu -> fc3->bn3->relu -> fc4.

    BN scale is pre-folded into the weight rows, so each hidden layer is
    relu(W_folded @ h + shift).  Batch lives on the LANE axis inside the
    kernel even though x arrives batch-major:

      x_ref  : (T, 5)    batch-major input tile (lane-padded only in VMEM)
      wN_ref : (out, in) BN-scale-folded weights
      p_ref  : (128, 4)  f32 per-channel shifts:
                 col0 bn1 shift (rows 0..127)
                 col1 bn2 shift (rows 0..31)
                 col2 bn3 shift (rows 0..31)
                 col3 fc4 bias  (rows 0..1)
      o_ref  : (2, T)    output tile, lane-dense -> unmasked stores
    """
    p = p_ref[...]                                    # (128, 4) f32
    t1 = p[:, 0:1]                                    # (128, 1)
    t2 = p[:_HID2, 1:2]                               # (32, 1)
    t3 = p[:_HID2, 2:3]                               # (32, 1)
    b4 = p[:_OUT, 3:4]                                # (2, 1)

    # fc1 (K=5): contract w1's in-dim with x's last dim -> (128, T).
    # Reorientation (batch -> lanes) happens here, inside the kernel.
    h = lax.dot_general(w1_ref[...], x_ref[...],
                        (((1,), (1,)), ((), ())),
                        preferred_element_type=jnp.float32)
    h = jnp.maximum(h + t1, 0.0)                      # (128, T) f32

    # fc2 (+ folded bn2) + relu
    h = jnp.dot(w2_ref[...], h.astype(w2_ref.dtype),
                preferred_element_type=jnp.float32)
    h = jnp.maximum(h + t2, 0.0)                      # (32, T) f32

    # fc3 (+ folded bn3) + relu
    h = jnp.dot(w3_ref[...], h.astype(w3_ref.dtype),
                preferred_element_type=jnp.float32)
    h = jnp.maximum(h + t3, 0.0)                      # (32, T) f32

    # fc4 (no bn / activation)
    out = jnp.dot(w4_ref[...], h.astype(w4_ref.dtype),
                  preferred_element_type=jnp.float32) + b4
    o_ref[...] = out.astype(o_ref.dtype)              # (2, T)


def _round_up(a, b):
    return pl.cdiv(a, b) * b


def _vmem_budget_bytes(tile, in_itemsize):
    """Rough VMEM need for one grid step (double-buffered I/O + intermediates)."""
    x_buf = tile * 128 * in_itemsize          # (tile, 5) block, lane-padded 5->128
    out_buf = 8 * tile * 4                    # (2, tile) f32 block, sublane-padded
    wp_buf = 48 * 1024 * in_itemsize + 64 * 1024   # all weights + packed params
    interm = (_HID1 + 2 * _HID2 + 8) * 4 * tile    # h1, h2, h3, out in f32
    slack = 8 << 20                            # compiler temps / pipelining headroom
    return 2 * (x_buf + out_buf + wp_buf) + interm + slack


def bgrxy_mlp_forward(x, params, *, tile_n=16384, compute_dtype=jnp.float32):
    """Fused MLP forward.  x: (N, 5) float32 -> (N, 2) float32."""
    N, in_dim = x.shape
    assert in_dim == _IN

    eps = 1e-5

    def fold(w_oi, b, g, beta, m, v):
        # bn((W x) + b) = (W*scale) x + ((b - m)*scale + beta)
        scale = g / jnp.sqrt(v + eps)
        shift = (b - m) * scale + beta
        return w_oi * scale[:, None], shift

    # Weights in (out, in) layout, BN scale folded into the rows.
    w1f, t1 = fold(params["w1"].T, params["b1"], params["bn1_g"],
                   params["bn1_b"], params["bn1_m"], params["bn1_v"])
    w2f, t2 = fold(params["w2"].T, params["b2"], params["bn2_g"],
                   params["bn2_b"], params["bn2_m"], params["bn2_v"])
    w3f, t3 = fold(params["w3"].T, params["b3"], params["bn3_g"],
                   params["bn3_b"], params["bn3_m"], params["bn3_v"])
    w4 = params["w4"].T                               # (2, 32)

    w1f = w1f.astype(compute_dtype)                   # (128, 5)
    w2f = w2f.astype(compute_dtype)                   # (32, 128)
    w3f = w3f.astype(compute_dtype)                   # (32, 32)
    w4 = w4.astype(compute_dtype)                     # (2, 32)

    # Pack all per-channel shifts + fc4 bias into one (128, 4) f32 array.
    P = jnp.zeros((_HID1, _PCOLS), jnp.float32)
    P = P.at[:, 0].set(t1)
    P = P.at[:_HID2, 1].set(t2)
    P = P.at[:_HID2, 2].set(t3)
    P = P.at[:_OUT, 3].set(params["b4"])

    itemsize = jnp.dtype(compute_dtype).itemsize

    # Tile selection: big tiles amortize the per-step overhead, but keep the
    # grid at >= 2 steps (v7x has 2 TensorCores) and stay inside a VMEM
    # budget that is safe on every generation.
    tile = max(256, min(int(tile_n), _round_up(pl.cdiv(N, 2), 256)))
    tile = _round_up(tile, 256)
    while tile > 256 and _vmem_budget_bytes(tile, itemsize) > _VMEM_CAP_BYTES:
        tile = max(256, _round_up(tile // 2, 256))
    vmem_limit = int(min(_vmem_budget_bytes(tile, itemsize), _VMEM_CAP_BYTES))

    n_pad = _round_up(N, tile)
    xp = jnp.pad(x, ((0, n_pad - N), (0, 0))) if n_pad != N else x
    xp = xp.astype(compute_dtype)                     # (n_pad, 5), batch-major

    grid = (n_pad // tile,)

    def const_spec(shape):
        # whole-array block, same block index for every grid step -> no re-DMA
        return pl.BlockSpec(shape, lambda i: (0, 0))

    out_t = pl.pallas_call(
        _mlp_kernel,
        out_shape=jax.ShapeDtypeStruct((_OUT, n_pad), jnp.float32),
        grid_spec=pltpu.PrefetchScalarGridSpec(
            num_scalar_prefetch=0,
            grid=grid,
            in_specs=[
                pl.BlockSpec((tile, _IN), lambda i: (i, 0)),   # x tile (batch-major)
                const_spec(w1f.shape),
                const_spec(w2f.shape),
                const_spec(w3f.shape),
                const_spec(w4.shape),
                const_spec(P.shape),
            ],
            out_specs=pl.BlockSpec((_OUT, tile), lambda i: (0, i)),
        ),
        compiler_params=pltpu.CompilerParams(
            dimension_semantics=("parallel",),
            vmem_limit_bytes=vmem_limit),
    )(xp, w1f, w2f, w3f, w4, P)

    # Slice padded columns off *before* transposing back to (N, 2).
    return out_t[:, :N].T


def init_params(key):
    """Deterministic synthetic parameters matching BGRXYMLPNet_ shapes."""
    dims = [(5, 128), (128, 32), (32, 32), (32, 2)]
    params = {}
    keys = jax.random.split(key, 32)
    ki = 0

    for li, (din, dout) in enumerate(dims, start=1):
        bound = 1.0 / jnp.sqrt(jnp.float32(din))
        params[f"w{li}"] = jax.random.uniform(
            keys[ki], (din, dout), jnp.float32, -bound, bound); ki += 1
        params[f"b{li}"] = jax.random.uniform(
            keys[ki], (dout,), jnp.float32, -bound, bound); ki += 1

    for li, c in zip((1, 2, 3), (128, 32, 32)):
        params[f"bn{li}_g"] = 1.0 + 0.1 * jax.random.normal(keys[ki], (c,), jnp.float32); ki += 1
        params[f"bn{li}_b"] = 0.1 * jax.random.normal(keys[ki], (c,), jnp.float32); ki += 1
        params[f"bn{li}_m"] = 0.05 * jax.random.normal(keys[ki], (c,), jnp.float32); ki += 1
        params[f"bn{li}_v"] = 1.0 + 0.1 * jax.random.uniform(keys[ki], (c,), jnp.float32); ki += 1

    return params


def reference_forward(x, params):
    """Pure-JAX reference of the same forward pass (eval-mode BN)."""
    eps = 1e-5

    def bn(h, g, b, m, v):
        return (h - m) / jnp.sqrt(v + eps) * g + b

    h = jnp.maximum(bn(x @ params["w1"] + params["b1"],
                       params["bn1_g"], params["bn1_b"], params["bn1_m"], params["bn1_v"]), 0.0)
    h = jnp.maximum(bn(h @ params["w2"] + params["b2"],
                       params["bn2_g"], params["bn2_b"], params["bn2_m"], params["bn2_v"]), 0.0)
    h = jnp.maximum(bn(h @ params["w3"] + params["b3"],
                       params["bn3_g"], params["bn3_b"], params["bn3_m"], params["bn3_v"]), 0.0)
    return h @ params["w4"] + params["b4"]


if __name__ == "__main__":
    key = jax.random.PRNGKey(0)
    pkey, xkey = jax.random.split(key)

    params = init_params(pkey)

    # Small, non-multiple batch: exercises padding and the >=2-step grid path.
    N = 300
    x = jax.random.normal(xkey, (N, 5), jnp.float32)

    ref = reference_forward(x, params)

    # Default f32 MXU-operand path (exact).
    out = jax.block_until_ready(bgrxy_mlp_forward(x, params))
    assert out.shape == (N, 2)
    assert jnp.allclose(out, ref, atol=1e-4, rtol=1e-4), "f32 mismatch vs JAX reference"

    # bf16 MXU-operand path (f32 accumulation, f32 BN/ReLU) for v6e/v7x bandwidth.
    out_bf16 = jax.block_until_ready(
        bgrxy_mlp_forward(x, params, compute_dtype=jnp.bfloat16))
    assert out_bf16.shape == (N, 2)
    assert jnp.allclose(out_bf16, ref, atol=1e-1, rtol=1e-1), "bf16 mismatch vs JAX reference"

    print("KERNEL_OK")
</pallas_src>

<mosaic_0001>
module attributes {stable_mosaic.version = 11 : i64} {
  func.func @_mlp_kernel(%arg0: i32, %arg1: memref<256x5xf32, #tpu.memory_space<vmem>>, %arg2: memref<128x5xf32, #tpu.memory_space<vmem>>, %arg3: memref<32x128xf32, #tpu.memory_space<vmem>>, %arg4: memref<32x32xf32, #tpu.memory_space<vmem>>, %arg5: memref<2x32xf32, #tpu.memory_space<vmem>>, %arg6: memref<128x4xf32, #tpu.memory_space<vmem>>, %arg7: memref<2x256xf32, #tpu.memory_space<vmem>>) attributes {dimension_semantics = [#tpu.dimension_semantics<parallel>], iteration_bounds = array<i64: 2>, scalar_prefetch = 0 : i64, scratch_operands = 0 : i64, tpu.core_type = #tpu.core_type<tc>, window_params = [{transform_indices = @transform_0, window_bounds = array<i64: 256, 5>}, {pipeline_mode = #tpu.pipeline_mode<synchronous>, transform_indices = @transform_1, window_bounds = array<i64: 128, 5>}, {pipeline_mode = #tpu.pipeline_mode<synchronous>, transform_indices = @transform_2, window_bounds = array<i64: 32, 128>}, {pipeline_mode = #tpu.pipeline_mode<synchronous>, transform_indices = @transform_3, window_bounds = array<i64: 32, 32>}, {pipeline_mode = #tpu.pipeline_mode<synchronous>, transform_indices = @transform_4, window_bounds = array<i64: 2, 32>}, {pipeline_mode = #tpu.pipeline_mode<synchronous>, transform_indices = @transform_5, window_bounds = array<i64: 128, 4>}, {transform_indices = @transform_6, window_bounds = array<i64: 2, 256>}]} {
    %c0 = arith.constant 0 : index
    %c0_0 = arith.constant 0 : index
    %0 = vector.load %arg6[%c0, %c0_0] : memref<128x4xf32, #tpu.memory_space<vmem>>, vector<128x4xf32>
    %1 = vector.extract_strided_slice %0 {offsets = [0, 0], sizes = [128, 1], strides = [1, 1]} : vector<128x4xf32> to vector<128x1xf32>
    %2 = vector.extract_strided_slice %0 {offsets = [0, 1], sizes = [32, 1], strides = [1, 1]} : vector<128x4xf32> to vector<32x1xf32>
    %3 = vector.extract_strided_slice %0 {offsets = [0, 2], sizes = [32, 1], strides = [1, 1]} : vector<128x4xf32> to vector<32x1xf32>
    %4 = vector.extract_strided_slice %0 {offsets = [0, 3], sizes = [2, 1], strides = [1, 1]} : vector<128x4xf32> to vector<2x1xf32>
    %c0_1 = arith.constant 0 : index
    %c0_2 = arith.constant 0 : index
    %5 = vector.load %arg2[%c0_1, %c0_2] : memref<128x5xf32, #tpu.memory_space<vmem>>, vector<128x5xf32>
    %c0_3 = arith.constant 0 : index
    %c0_4 = arith.constant 0 : index
    %6 = vector.load %arg1[%c0_3, %c0_4] : memref<256x5xf32, #tpu.memory_space<vmem>>, vector<256x5xf32>
    %cst = arith.constant dense<0.000000e+00> : vector<128x256xf32>
    %7 = tpu.matmul %5, %6, %cst {dimension_numbers = #tpu.dot_dimension_numbers<[1], [1], [0], [0], [0, 0, 1, 0], [], []>} : vector<128x5xf32>, vector<256x5xf32>, vector<128x256xf32> -> vector<128x256xf32>
    %8 = vector.broadcast %1 : vector<128x1xf32> to vector<128x256xf32>
    %9 = arith.addf %7, %8 : vector<128x256xf32>
    %cst_5 = arith.constant 0.000000e+00 : f32
    %10 = vector.broadcast %cst_5 : f32 to vector<128x256xf32>
    %11 = arith.maximumf %9, %10 : vector<128x256xf32>
    %c0_6 = arith.constant 0 : index
    %c0_7 = arith.constant 0 : index
    %12 = vector.load %arg3[%c0_6, %c0_7] : memref<32x128xf32, #tpu.memory_space<vmem>>, vector<32x128xf32>
    %cst_8 = arith.constant dense<0.000000e+00> : vector<32x256xf32>
    %13 = tpu.matmul %12, %11, %cst_8 {dimension_numbers = #tpu.dot_dimension_numbers<[1], [0], [0], [1], [0, 0, 1, 1], [], []>} : vector<32x128xf32>, vector<128x256xf32>, vector<32x256xf32> -> vector<32x256xf32>
    %14 = vector.broadcast %2 : vector<32x1xf32> to vector<32x256xf32>
    %15 = arith.addf %13, %14 : vector<32x256xf32>
    %cst_9 = arith.constant 0.000000e+00 : f32
    %16 = vector.broadcast %cst_9 : f32 to vector<32x256xf32>
    %17 = arith.maximumf %15, %16 : vector<32x256xf32>
    %c0_10 = arith.constant 0 : index
    %c0_11 = arith.constant 0 : index
    %18 = vector.load %arg4[%c0_10, %c0_11] : memref<32x32xf32, #tpu.memory_space<vmem>>, vector<32x32xf32>
    %cst_12 = arith.constant dense<0.000000e+00> : vector<32x256xf32>
    %19 = tpu.matmul %18, %17, %cst_12 {dimension_numbers = #tpu.dot_dimension_numbers<[1], [0], [0], [1], [0, 0, 1, 1], [], []>} : vector<32x32xf32>, vector<32x256xf32>, vector<32x256xf32> -> vector<32x256xf32>
    %20 = vector.broadcast %3 : vector<32x1xf32> to vector<32x256xf32>
    %21 = arith.addf %19, %20 : vector<32x256xf32>
    %cst_13 = arith.constant 0.000000e+00 : f32
    %22 = vector.broadcast %cst_13 : f32 to vector<32x256xf32>
    %23 = arith.maximumf %21, %22 : vector<32x256xf32>
    %c0_14 = arith.constant 0 : index
    %c0_15 = arith.constant 0 : index
    %24 = vector.load %arg5[%c0_14, %c0_15] : memref<2x32xf32, #tpu.memory_space<vmem>>, vector<2x32xf32>
    %cst_16 = arith.constant dense<0.000000e+00> : vector<2x256xf32>
    %25 = tpu.matmul %24, %23, %cst_16 {dimension_numbers = #tpu.dot_dimension_numbers<[1], [0], [0], [1], [0, 0, 1, 1], [], []>} : vector<2x32xf32>, vector<32x256xf32>, vector<2x256xf32> -> vector<2x256xf32>
    %26 = vector.broadcast %4 : vector<2x1xf32> to vector<2x256xf32>
    %27 = arith.addf %25, %26 : vector<2x256xf32>
    %c0_17 = arith.constant 0 : index
    %c0_18 = arith.constant 0 : index
    %28 = vector.load %arg7[%c0_17, %c0_18] : memref<2x256xf32, #tpu.memory_space<vmem>>, vector<2x256xf32>
    tpu.vector_store %arg7[%c0_17, %c0_18], %27 {strides = array<i32>} : memref<2x256xf32, #tpu.memory_space<vmem>>, vector<2x256xf32>,
    return
  }
  func.func @transform_0(%arg0: i32) -> (i32, i32) {
    %c0_i32 = arith.constant 0 : i32
    %c0_i32_0 = arith.constant 0 : i32
    return %arg0, %c0_i32 : i32, i32
  }
  func.func @transform_1(%arg0: i32) -> (i32, i32) {
    %c0_i32 = arith.constant 0 : i32
    %c0_i32_0 = arith.constant 0 : i32
    %c0_i32_1 = arith.constant 0 : i32
    return %c0_i32, %c0_i32_0 : i32, i32
  }
  func.func @transform_2(%arg0: i32) -> (i32, i32) {
    %c0_i32 = arith.constant 0 : i32
    %c0_i32_0 = arith.constant 0 : i32
    %c0_i32_1 = arith.constant 0 : i32
    return %c0_i32, %c0_i32_0 : i32, i32
  }
  func.func @transform_3(%arg0: i32) -> (i32, i32) {
    %c0_i32 = arith.constant 0 : i32
    %c0_i32_0 = arith.constant 0 : i32
    %c0_i32_1 = arith.constant 0 : i32
    return %c0_i32, %c0_i32_0 : i32, i32
  }
  func.func @transform_4(%arg0: i32) -> (i32, i32) {
    %c0_i32 = arith.constant 0 : i32
    %c0_i32_0 = arith.constant 0 : i32
    %c0_i32_1 = arith.constant 0 : i32
    return %c0_i32, %c0_i32_0 : i32, i32
  }
  func.func @transform_5(%arg0: i32) -> (i32, i32) {
    %c0_i32 = arith.constant 0 : i32
    %c0_i32_0 = arith.constant 0 : i32
    %c0_i32_1 = arith.constant 0 : i32
    return %c0_i32, %c0_i32_0 : i32, i32
  }
  func.func @transform_6(%arg0: i32) -> (i32, i32) {
    %c0_i32 = arith.constant 0 : i32
    %c0_i32_0 = arith.constant 0 : i32
    return %c0_i32, %arg0 : i32, i32
  }
}

</mosaic_0001>

<bundles_post_ra>
// kernel: tpu_custom_call.1
= control target key start
LH: loop header
LB: loop body
LE: loop exit
PB: predicated region body
PF: predicated region fallthrough
CT: control target
= control target key end

     0   :  { %11 = vsyncpa [#allocation3], 0  ;;  %s1895_s0 = inlined_call_operand.vmem [shape: f32[512,5], index: 0, kind: input, shape index: {}]   ;;  %s1896_s1 = inlined_call_operand.vmem [shape: f32[128,5], index: 1, kind: input, shape index: {}]   ;;  %s1897_s2 = inlined_call_operand.vmem [shape: f32[32,128], index: 2, kind: input, shape index: {}]   ;;  %s1898_s3 = inlined_call_operand.vmem [shape: f32[32,32], index: 3, kind: input, shape index: {}]   ;;  %s1899_s4 = inlined_call_operand.vmem [shape: f32[2,32], index: 4, kind: input, shape index: {}]   ;;  %s1900_s5 = inlined_call_operand.vmem [shape: f32[128,4], index: 5, kind: input, shape index: {}]   ;;  %s1901_s6 = inlined_call_operand.hbm [shape: f32[2,512], index: 6, kind: output, shape index: {}]  }
   0x1   :  { %13 = vsyncpa [#allocation3 + $0x1], 0  ;;  %s1530_s21 = smov 0   ;;  %s1532_s22 = smov 0  }
   0x2   :  { %s1534_s23 = smov 0   ;;  %s1536_s24 = smov 0  }
   0x3 LB: > { %s1551_s25 = sadd.s32 4294967295, %s1487_s24   ;;  %s1147_s26 = sadd.s32 4294967294, %s1487_s24   ;;  %s1487_s24 = sphi %s1536_s24, %s1909_s24   ;;  %s1483_s23 = sphi %s1534_s23, %s1908_s23   ;;  %s1479_s22 = sphi %s1532_s22, %s1907_s22   ;;  %s1475_s21 = sphi %s1530_s21, %s1906_s21  }
   0x4   : > { %s1555_s27 = sadd.s32 1, %s1487_s24   ;;  %s157_s28 = sadd.s32 1, %s1483_s23 }
   0x5   : > { %s154_s29 = ssub.s32 %s1487_s24, %s1555_s27  ;;  %p167_p0 = scmp.ne.s32.totalorder %s1483_s23, %s1479_s22 }
   0x6   : > { %p155_p1 = scmp.eq.s32.totalorder %s154_s29, 0  ;;  %p168_p2 = scmp.eq.s32.totalorder %s1551_s25, 1 }
   0x7   : > { %p173_p3 = scmp.ne.s32.totalorder %s1479_s22, %s1475_s21  ;;  %p174_p4 = scmp.eq.s32.totalorder %s1147_s26, 1 }
   0x8   : > { %s1566_s30 = scalar_select %p155_p1, %s1483_s23, %s157_s28  }
   0x9   : > { %p1568_p5 = por %p168_p2, %p167_p0  ;;  %p1572_p6 = por %p174_p4, %p173_p3 }
   0xa   : > { %p1150_p7 = scmp.ge.s32.totalorder %s1487_s24, 1  ;;  %p216_p8 = scmp.lt.s32.totalorder %s1487_s24, 3 }
   0xc   : > { %p217_p9 = pnand %p1150_p7, %p216_p8 }
   0xd   : > { %s1152_s9 = sshll.u32 (!%p217_p9), %s1551_s25, 5  ;;  %vm397_vm0 = vcmask (!%p217_p9), 39936   ;;  %v1582_v0 = vld [vmem:[%s1896_s1] sm:$0xff] (!%p217_p9)  ;;  %v1605_v3 = vld [vmem:[%s1900_s5 + $0x10] sm:$0xff] (!%p217_p9)  ;;  %v1489_v7 = vmov (!%p217_p9), 0   ;;  %v1618_v14 = vld [vmem:[%s1900_s5 + $0x8] sm:$0xff] (!%p217_p9) }
   0xe   : > { %220 = sbr.rel (%p217_p9) target bundleno = 1075 (0x433), region = 44  ;;  %p247_p10 = scmp.lt.s32.totalorder (!%p217_p9), %s1152_s9, 63  ;;  %1246 = vmatprep.mubr.msk.f32.mxu0 (!%p217_p9), %vm397_vm0, %v1582_v0  ;;  %vm1593_vm1 = vmpackc.low (!%p217_p9), %vm397_vm0, %vm397_vm0  ;;  %v1600_v2 = vld [vmem:[%s1900_s5] sm:$0xff] (!%p217_p9)  ;;  %1418 = vset.pattern.permute.xlu0 (!%p217_p9), %v1489_v7  ;;  %v1634_v21 = vld [vmem:[%s1900_s5 + $0x18] sm:$0xff] (!%p217_p9)  ;;  %vm872_vm2 = vcmask (!%p217_p9), 261120  }
   0xf   : > { %1419 = vset.pattern.permute.xlu1 (!%p217_p9), %v1489_v7  ;;  %319 = vperm.xlu0 (!%p217_p9), %1418, %v1600_v2   ;;  %v257_v22 = vld [vmem:[%s1900_s5 + $0x20] sm:$0xff] (!%p217_p9)  ;;  %v258_v23 = vld [vmem:[%s1900_s5 + $0x28] sm:$0xff] (!%p217_p9)  ;;  %v259_v26 = vld [vmem:[%s1900_s5 + $0x30] sm:$0xff] (!%p217_p9)  ;;  %s243_s29 = sand.u32 (!%p217_p9), 1, %s1479_s22  }
  0x10   : > { %329 = vperm.xlu1 (!%p217_p9), %1419, %v1605_v3   ;;  %v260_v30 = vld [vmem:[%s1900_s5 + $0x38] sm:$0xff] (!%p217_p9)  ;;  %v261_v32 = vld [vmem:[%s1900_s5 + $0x40] sm:$0xff] (!%p217_p9)  ;;  %v262_v33 = vld [vmem:[%s1900_s5 + $0x48] sm:$0xff] (!%p217_p9)  ;;  %s1074_s16 = scalar_lea.sflag (!%p217_p9), [#allocation3], %s243_s29 }
  0x11   : > { %v263_v36 = vld [vmem:[%s1900_s5 + $0x50] sm:$0xff] (!%p217_p9)  ;;  %v264_v40 = vld [vmem:[%s1900_s5 + $0x58] sm:$0xff] (!%p217_p9)  ;;  %v265_v42 = vld [vmem:[%s1900_s5 + $0x60] sm:$0xff] (!%p217_p9) }
  0x12   : > { %v266_v43 = vld [vmem:[%s1900_s5 + $0x68] sm:$0xff] (!%p217_p9)  ;;  %v267_v46 = vld [vmem:[%s1900_s5 + $0x70] sm:$0xff] (!%p217_p9)  ;;  %v268_v50 = vld [vmem:[%s1900_s5 + $0x78] sm:$0xff] (!%p217_p9) }
  0x13   : > { %324 = vperm.xlu0 (!%p217_p9), %1418, %v1618_v14   ;;  %v270_v7 = vld [vmem:[%s1896_s1 + $0x8] sm:$0xff] (!%p217_p9)  ;;  %v272_v1 = vld [vmem:[%s1896_s1 + $0x18] sm:$0xff] (!%p217_p9) }
  0x14   : > { %334 = vperm.xlu1 (!%p217_p9), %1419, %v1634_v21  }
  0x15   : > { %s1911_s9 = smov (!%p247_p10, %s1152_s9), 63 }
  0x16   : > { %s1153_s12 = sshll.u32 %s1911_s9, 3  ;;  %s1213_s9 = sshll.u32 %s1551_s25, 6 }
  0x17   : > { %s1589_s15 = scalar_lea.vmem %s1895_s0, %s1153_s12  ;;  %339 = vperm.xlu0 %1418, %v257_v22   ;;  %v1490_v22 = vmov 0.0   ;;  %s1853_s14 = scalar_lea.hbm %s1901_s6, %s1213_s9 }
  0x18   : > { %v301_v4 = vld [vmem:[%s1589_s15 + $0x80] sm:$0xff]  ;;  %v302_v5 = vld [vmem:[%s1589_s15 + $0x88] sm:$0xff]  ;;  %v303_v10 = vld [vmem:[%s1589_s15 + $0x90] sm:$0xff]  ;;  %344 = vperm.xlu1 %1419, %v258_v23   ;;  %819 = vmatprep.mubr.f32.mxu1 %v1490_v22  ;;  %v1491_v23 = vmov 1   ;;  %s1494_s25 = smov [#allocation2]  }
  0x19   : > { %v285_v6 = vld [vmem:[%s1589_s15] sm:$0xff]  ;;  %v1278_v8 = vpack.c.bf16 %v302_v5, %v301_v4  ;;  %v286_v9 = vld [vmem:[%s1589_s15 + $0x8] sm:$0xff]  ;;  %v304_v11 = vld [vmem:[%s1589_s15 + $0x98] sm:$0xff]  ;;  %s1429_s18 = sshll.u32 %s1494_s25, 4  ;;  %s1430_s18 = int_to_ptr.vmem [resolvable:$false] %s1429_s18 }
  0x1a   : > { %v1281_v12 = vpack.c.bf16 %v286_v9, %v285_v6  ;;  %v1284_v13 = vpack.c.bf16 %v304_v11, %v303_v10  ;;  %v287_v15 = vld [vmem:[%s1589_s15 + $0x10] sm:$0xff]  ;;  %v288_v16 = vld [vmem:[%s1589_s15 + $0x18] sm:$0xff]  ;;  %v305_v17 = vld [vmem:[%s1589_s15 + $0xa0] sm:$0xff]  ;;  %s1431_s19 = scalar_lea.vmem %s1430_s18, 128 }
  0x1b   : > { %1280 = vmatprep.subr.msk.bf16.mxu0 %vm1593_vm1, %v1278_v8  ;;  %v306_v18 = vld [vmem:[%s1589_s15 + $0xa8] sm:$0xff]  ;;  %v1287_v19 = vpack.c.bf16 %v288_v16, %v287_v15  ;;  %v289_v24 = vld [vmem:[%s1589_s15 + $0x20] sm:$0xff]  ;;  %v307_v27 = vld [vmem:[%s1589_s15 + $0xb0] sm:$0xff]  ;;  %349 = vperm.xlu0 %1418, %v259_v26  }
  0x1c   : > { %1283 = vmatpush3.bf16.xpose.msk.msra.mxu0 %vm1593_vm1, %v1281_v12  ;;  %v1290_v20 = vpack.c.bf16 %v306_v18, %v305_v17  ;;  %v290_v25 = vld [vmem:[%s1589_s15 + $0x28] sm:$0xff]  ;;  %v308_v28 = vld [vmem:[%s1589_s15 + $0xb8] sm:$0xff]  ;;  %354 = vperm.xlu1 %1419, %v260_v30   ;;  %v291_v34 = vld [vmem:[%s1589_s15 + $0x30] sm:$0xff] }
  0x1d   : > { %1286 = vmatprep.subr.msk.bf16.mxu0 %vm1593_vm1, %v1284_v13  ;;  %v1293_v29 = vpack.c.bf16 %v290_v25, %v289_v24  ;;  %v1296_v31 = vpack.c.bf16 %v308_v28, %v307_v27  ;;  %v292_v35 = vld [vmem:[%s1589_s15 + $0x38] sm:$0xff]  ;;  %v309_v37 = vld [vmem:[%s1589_s15 + $0xc0] sm:$0xff]  ;;  %v310_v38 = vld [vmem:[%s1589_s15 + $0xc8] sm:$0xff] }
  0x1e   : > { %v1299_v39 = vpack.c.bf16 %v292_v35, %v291_v34  ;;  %v1302_v41 = vpack.c.bf16 %v310_v38, %v309_v37  ;;  %v293_v44 = vld [vmem:[%s1589_s15 + $0x40] sm:$0xff]  ;;  %v294_v45 = vld [vmem:[%s1589_s15 + $0x48] sm:$0xff]  ;;  %v311_v47 = vld [vmem:[%s1589_s15 + $0xd0] sm:$0xff] }
  0x1f   : > { %359 = vperm.xlu0 %1418, %v261_v32   ;;  %v312_v48 = vld [vmem:[%s1589_s15 + $0xd8] sm:$0xff]  ;;  %v1305_v49 = vpack.c.bf16 %v294_v45, %v293_v44  ;;  %v295_v52 = vld [vmem:[%s1589_s15 + $0x50] sm:$0xff]  ;;  %v313_v54 = vld [vmem:[%s1589_s15 + $0xe0] sm:$0xff] }
  0x20   : > { %364 = vperm.xlu1 %1419, %v262_v33   ;;  %v1308_v51 = vpack.c.bf16 %v312_v48, %v311_v47  ;;  %v296_v53 = vld [vmem:[%s1589_s15 + $0x58] sm:$0xff]  ;;  %v314_v55 = vld [vmem:[%s1589_s15 + $0xe8] sm:$0xff]  ;;  %v297_v58 = vld [vmem:[%s1589_s15 + $0x60] sm:$0xff] }
  0x21   : > { %v1311_v56 = vpack.c.bf16 %v296_v53, %v295_v52  ;;  %v1314_v57 = vpack.c.bf16 %v314_v55, %v313_v54  ;;  %v298_v59 = vld [vmem:[%s1589_s15 + $0x68] sm:$0xff]  ;;  %v315_v60 = vld [vmem:[%s1589_s15 + $0xf0] sm:$0xff]  ;;  %v316_v61 = vld [vmem:[%s1589_s15 + $0xf8] sm:$0xff] }
  0x22   : > { %v1317_v62 = vpack.c.bf16 %v298_v59, %v297_v58  ;;  %v1320_v63 = vpack.c.bf16 %v316_v61, %v315_v60  ;;  %v299_v4 = vld [vmem:[%s1589_s15 + $0x70] sm:$0xff]  ;;  %v300_v5 = vld [vmem:[%s1589_s15 + $0x78] sm:$0xff]  ;;  %v274_v9 = vld [vmem:[%s1896_s1 + $0x28] sm:$0xff]  ;;  %s1151_s15 = sshll.u32 %s243_s29, 2 }
  0x23   : > { %369 = vperm.xlu0 %1418, %v263_v36   ;;  %v1323_v6 = vpack.c.bf16 %v300_v5, %v299_v4  ;;  %v271_v8 = vld [vmem:[%s1896_s1 + $0x10] sm:$0xff]  ;;  %v276_v11 = vld [vmem:[%s1896_s1 + $0x38] sm:$0xff]  ;;  %v277_v12 = vld [vmem:[%s1896_s1 + $0x40] sm:$0xff]  ;;  %s245_s10 = scalar_lea.vmem [#allocation2], %s1151_s15 }
  0x24   : > { %1289 = vmatpush3.bf16.xpose.msk.msra.mxu0 %vm1593_vm1, %v1287_v19  ;;  %374 = vperm.xlu1 %1419, %v264_v40   ;;  %v275_v10 = vld [vmem:[%s1896_s1 + $0x30] sm:$0xff]  ;;  %v278_v13 = vld [vmem:[%s1896_s1 + $0x48] sm:$0xff]  ;;  %v280_v16 = vld [vmem:[%s1896_s1 + $0x58] sm:$0xff]  ;;  %s1088_s11 = sshll.u32 %s245_s10, 4  ;;  %s1855_s11 = int_to_ptr.vmem [resolvable:$true] %s1088_s11 }
  0x25   : > { %1292 = vmatprep.subr.msk.bf16.mxu0 %vm1593_vm1, %v1290_v20  ;;  %v279_v15 = vld [vmem:[%s1896_s1 + $0x50] sm:$0xff]  ;;  %v281_v17 = vld [vmem:[%s1896_s1 + $0x60] sm:$0xff]  ;;  %v282_v18 = vld [vmem:[%s1896_s1 + $0x68] sm:$0xff]  ;;  %s1425_s17 = scalar_lea.vmem %s1855_s11, 64  ;;  %p1432_p0 = scmp.lt.s32.totalorder %s1855_s11, %s1430_s18 }
  0x26   : > { %v283_v19 = vld [vmem:[%s1896_s1 + $0x70] sm:$0xff]  ;;  %v284_v20 = vld [vmem:[%s1896_s1 + $0x78] sm:$0xff]  ;;  %p1426_p11 = scmp.ne.s32.totalorder %s1855_s11, %s1425_s17  ;;  %p1433_p1 = scmp.lt.s32.totalorder %s1431_s19, %s1425_s17 }
  0x27   : > { %379 = vperm.xlu0 %1418, %v265_v42  }
  0x28   : > { %384 = vperm.xlu1 %1419, %v266_v43   ;;  %p1427_p12 = pnand %p1426_p11, %p1568_p5  ;;  %p1434_p2 = por %p1433_p1, %p1432_p0 }
  0x2a   : > { %p1428_p13 = pneg %p1427_p12 }
  0x2b   : > { %389 = vperm.xlu0 %1418, %v267_v46  }
  0x2c   : > { %1295 = vmatpush3.bf16.xpose.msk.msra.mxu0 %vm1593_vm1, %v1293_v29  ;;  %394 = vperm.xlu1 %1419, %v268_v50   ;;  %p1435_p3 = pnand %p1434_p2, %p1428_p13 }
  0x2d   : > { %1298 = vmatprep.subr.msk.bf16.mxu0 %vm1593_vm1, %v1296_v31 }
  0x2f   : > { %1420 = vset.pattern.permute.xlu0 %v1491_v23 }
  0x30   : > { %1421 = vset.pattern.permute.xlu1 %v1491_v23  ;;  %740 = vperm.xlu0 %1420, %v1600_v2  }
  0x31   : > { %744 = vperm.xlu1 %1421, %v1618_v14  }
  0x34   : > { %1301 = vmatpush3.bf16.xpose.msk.msra.mxu0 %vm1593_vm1, %v1299_v39  ;;  %752 = vperm.xlu0 %1420, %v1634_v21  }
  0x35   : > { %1304 = vmatprep.subr.msk.bf16.mxu0 %vm1593_vm1, %v1302_v41  ;;  %748 = vperm.xlu1 %1421, %v1605_v3  }
  0x3c   : > { %1307 = vmatpush3.bf16.xpose.msk.msra.mxu0 %vm1593_vm1, %v1305_v49 }
  0x3d   : > { %1310 = vmatprep.subr.msk.bf16.mxu0 %vm1593_vm1, %v1308_v51 }
  0x44   : > { %1313 = vmatpush3.bf16.xpose.msk.msra.mxu0 %vm1593_vm1, %v1311_v56 }
  0x45   : > { %1316 = vmatprep.subr.msk.bf16.mxu0 %vm1593_vm1, %v1314_v57 }
  0x4c   : > { %1319 = vmatpush3.bf16.xpose.msk.msra.mxu0 %vm1593_vm1, %v1317_v62 }
  0x4d   : > { %1322 = vmatprep.subr.msk.bf16.mxu0 %vm1593_vm1, %v1320_v63 }
  0x54   : > { %1325 = vmatpush3.bf16.xpose.msk.msra.mxu0 %vm1593_vm1, %v1323_v6 }
  0x5b   : > { %1247 = vmatmul.mubr.msk.f32.vlgmr.msra.gmra.mrb[0].mxu0 %vm397_vm0, %v1582_v0  ;;  %v273_v0 = vld [vmem:[%s1896_s1 + $0x20] sm:$0xff] }
  0x5c   : > { %1248 = vmatprep.mubr.msk.f32.mxu0 %vm397_vm0, %v270_v7 }
  0x5f   : > { %1249 = vmatmul.mubr.msk.f32.gmra.mrb[2].mxu0 %vm397_vm0, %v270_v7 }
  0x60   : > { %1250 = vmatprep.mubr.msk.f32.mxu0 %vm397_vm0, %v271_v8 }
  0x63   : > { %1251 = vmatmul.mubr.msk.f32.gmra.mrb[4].mxu0 %vm397_vm0, %v271_v8 }
  0x64   : > { %1252 = vmatprep.mubr.msk.f32.mxu0 %vm397_vm0, %v272_v1 }
  0x67   : > { %1253 = vmatmul.mubr.msk.f32.gmra.mrb[6].mxu0 %vm397_vm0, %v272_v1 }
  0x68   : > { %1254 = vmatprep.mubr.msk.f32.mxu0 %vm397_vm0, %v273_v0 }
  0x6b   : > { %1255 = vmatmul.mubr.msk.f32.gmra.mrb[8].mxu0 %vm397_vm0, %v273_v0 }
  0x6c   : > { %1256 = vmatprep.mubr.msk.f32.mxu0 %vm397_vm0, %v274_v9 }
  0x6f   : > { %1257 = vmatmul.mubr.msk.f32.gmra.mrb[10].mxu0 %vm397_vm0, %v274_v9 }
  0x70   : > { %1258 = vmatprep.mubr.msk.f32.mxu0 %vm397_vm0, %v275_v10 }
  0x73   : > { %1259 = vmatmul.mubr.msk.f32.gmra.mrb[12].mxu0 %vm397_vm0, %v275_v10 }
  0x74   : > { %1260 = vmatprep.mubr.msk.f32.mxu0 %vm397_vm0, %v276_v11 }
  0x77   : > { %1261 = vmatmul.mubr.msk.f32.gmra.mrb[14].mxu0 %vm397_vm0, %v276_v11 }
  0x78   : > { %1262 = vmatprep.mubr.msk.f32.mxu0 %vm397_vm0, %v277_v12 }
  0x7b   : > { %1263 = vmatmul.mubr.msk.f32.gmra.mrb[16].mxu0 %vm397_vm0, %v277_v12 }
  0x7c   : > { %1264 = vmatprep.mubr.msk.f32.mxu0 %vm397_vm0, %v278_v13 }
  0x7f   : > { %1265 = vmatmul.mubr.msk.f32.gmra.mrb[18].mxu0 %vm397_vm0, %v278_v13 }
  0x80   : > { %1266 = vmatprep.mubr.msk.f32.mxu0 %vm397_vm0, %v279_v15 }
  0x83   : > { %1267 = vmatmul.mubr.msk.f32.gmra.mrb[20].mxu0 %vm397_vm0, %v279_v15 }
  0x84   : > { %1268 = vmatprep.mubr.msk.f32.mxu0 %vm397_vm0, %v280_v16 }
  0x87   : > { %1269 = vmatmul.mubr.msk.f32.gmra.mrb[22].mxu0 %vm397_vm0, %v280_v16 }
  0x88   : > { %1270 = vmatprep.mubr.msk.f32.mxu0 %vm397_vm0, %v281_v17 }
  0x8b   : > { %1271 = vmatmul.mubr.msk.f32.gmra.mrb[24].mxu0 %vm397_vm0, %v281_v17 }
  0x8c   : > { %1272 = vmatprep.mubr.msk.f32.mxu0 %vm397_vm0, %v282_v18 }
  0x8e   : > { %v320_v24 = vpop.permute.xlu0 %319 }
  0x8f   : > { %1273 = vmatmul.mubr.msk.f32.gmra.mrb[26].mxu0 %vm397_vm0, %v282_v18  ;;  %v330_v33 = vpop.permute.xlu1 %329 }
  0x90   : > { %1274 = vmatprep.mubr.msk.f32.mxu0 %vm397_vm0, %v283_v19 }
  0x92   : > { %v325_v27 = vpop.permute.xlu0 %324 }
  0x93   : > { %1275 = vmatmul.mubr.msk.f32.gmra.mrb[28].mxu0 %vm397_vm0, %v283_v19  ;;  %v335_v44 = vpop.permute.xlu1 %334 }
  0x94   : > { %1276 = vmatprep.mubr.msk.f32.mxu0 %vm397_vm0, %v284_v20 }
  0x96   : > { %v340_v57 = vpop.permute.xlu0 %339 }
  0x97   : > { %1277 = vmatmul.mubr.msk.f32.gmra.mrb[30].mxu0 %vm397_vm0, %v284_v20  ;;  %v345_v60 = vpop.permute.xlu1 %344 }
  0x9a   : > { %v350_v11 = vpop.permute.xlu0 %349 }
  0x9b   : > { %v355_v15 = vpop.permute.xlu1 %354 }
 0x12e   : > { %v608_v25 = vpop.f32.mrb[0].mxu0 }
 0x12f   : > { %v610_v26 = vpop.f32.mrb[1].mxu0  ;;  %v609_v28 = vadd.f32 %v608_v25, %v320_v24 }
 0x130   : > { %v611_v29 = vadd.f32 %v610_v26, %v320_v24 }
 0x131   : > { %v703_v35 = vmax.f32 %v609_v28, 0.0 }
 0x132   : > { %v614_v30 = vpop.f32.mrb[2].mxu0  ;;  %v704_v37 = vmax.f32 %v611_v29, 0.0 }
 0x133   : > { %v615_v31 = vadd.f32 %v614_v30, %v325_v27  ;;  %v616_v32 = vpop.f32.mrb[3].mxu0  ;;  %v360_v30 = vpop.permute.xlu0 %359 }
 0x134   : > { %v617_v34 = vadd.f32 %v616_v32, %v325_v27 }
 0x135   : > { %v705_v36 = vmax.f32 %v615_v31, 0.0 }
 0x136   : > { %v706_v38 = vmax.f32 %v617_v34, 0.0  ;;  %v620_v39 = vpop.f32.mrb[4].mxu0 }
 0x137   : > { %v622_v40 = vpop.f32.mrb[5].mxu0  ;;  %v1328_v41 = vpack.c.bf16 %v705_v36, %v703_v35  ;;  %v621_v43 = vadd.f32 %v620_v39, %v330_v33 }
 0x138   : > { %v1326_v42 = vpack.c.bf16 %v706_v38, %v704_v37  ;;  %v623_v45 = vadd.f32 %v622_v40, %v330_v33  ;;  %v365_v33 = vpop.permute.xlu1 %364 }
 0x139   : > { %v707_v50 = vmax.f32 %v621_v43, 0.0 }
 0x13a   : > { %v626_v46 = vpop.f32.mrb[6].mxu0  ;;  %1327 = vmatprep.subr.bf16.mxu1 %v1326_v42  ;;  %v708_v52 = vmax.f32 %v623_v45, 0.0 }
 0x13b   : > { %v627_v47 = vadd.f32 %v626_v46, %v335_v44  ;;  %v628_v48 = vpop.f32.mrb[7].mxu0  ;;  %1329 = vmatpush1.bf16.msra.mxu1 %v1328_v41  ;;  %v370_v46 = vpop.permute.xlu0 %369 }
 0x13c   : > { %v629_v49 = vadd.f32 %v628_v48, %v335_v44 }
 0x13d   : > { %v709_v51 = vmax.f32 %v627_v47, 0.0 }
 0x13e   : > { %v710_v53 = vmax.f32 %v629_v49, 0.0  ;;  %v632_v54 = vpop.f32.mrb[8].mxu0  ;;  %v375_v49 = vpop.permute.xlu1 %374 }
 0x13f   : > { %v1332_v55 = vpack.c.bf16 %v709_v51, %v707_v50  ;;  %v634_v56 = vpop.f32.mrb[9].mxu0  ;;  %v633_v59 = vadd.f32 %v632_v54, %v340_v57 }
 0x140   : > { %v1330_v58 = vpack.c.bf16 %v710_v53, %v708_v52  ;;  %v635_v61 = vadd.f32 %v634_v56, %v340_v57 }
 0x141   : > { %v711_v6 = vmax.f32 %v633_v59, 0.0 }
 0x142   : > { %v638_v62 = vpop.f32.mrb[10].mxu0  ;;  %1331 = vmatprep.subr.bf16.mxu1 %v1330_v58  ;;  %v712_v8 = vmax.f32 %v635_v61, 0.0 }
 0x143   : > { %v639_v63 = vadd.f32 %v638_v62, %v345_v60  ;;  %v640_v4 = vpop.f32.mrb[11].mxu0  ;;  %1333 = vmatpush1.bf16.msra.mxu1 %v1332_v55  ;;  %v380_v62 = vpop.permute.xlu0 %379 }
 0x144   : > { %v641_v5 = vadd.f32 %v640_v4, %v345_v60 }
 0x145   : > { %v713_v7 = vmax.f32 %v639_v63, 0.0 }
 0x146   : > { %v714_v1 = vmax.f32 %v641_v5, 0.0  ;;  %v644_v0 = vpop.f32.mrb[12].mxu0  ;;  %v385_v5 = vpop.permute.xlu1 %384 }
 0x147   : > { %v1336_v9 = vpack.c.bf16 %v713_v7, %v711_v6  ;;  %v646_v10 = vpop.f32.mrb[13].mxu0  ;;  %v645_v13 = vadd.f32 %v644_v0, %v350_v11 }
 0x148   : > { %v1334_v12 = vpack.c.bf16 %v714_v1, %v712_v8  ;;  %v647_v16 = vadd.f32 %v646_v10, %v350_v11 }
 0x149   : > { %v715_v23 = vmax.f32 %v645_v13, 0.0 }
 0x14a   : > { %v650_v17 = vpop.f32.mrb[14].mxu0  ;;  %1335 = vmatprep.subr.bf16.mxu1 %v1334_v12  ;;  %v716_v25 = vmax.f32 %v647_v16, 0.0 }
 0x14b   : > { %v651_v18 = vadd.f32 %v650_v17, %v355_v15  ;;  %v652_v19 = vpop.f32.mrb[15].mxu0  ;;  %1337 = vmatpush1.bf16.msra.mxu1 %v1336_v9  ;;  %v390_v17 = vpop.permute.xlu0 %389 }
 0x14c   : > { %v653_v20 = vadd.f32 %v652_v19, %v355_v15 }
 0x14d   : > { %v717_v24 = vmax.f32 %v651_v18, 0.0 }
 0x14e   : > { %v718_v26 = vmax.f32 %v653_v20, 0.0  ;;  %v656_v27 = vpop.f32.mrb[16].mxu0  ;;  %v395_v20 = vpop.permute.xlu1 %394 }
 0x14f   : > { %v1340_v28 = vpack.c.bf16 %v717_v24, %v715_v23  ;;  %v658_v29 = vpop.f32.mrb[17].mxu0  ;;  %v657_v32 = vadd.f32 %v656_v27, %v360_v30 }
 0x150   : > { %v1338_v31 = vpack.c.bf16 %v718_v26, %v716_v25  ;;  %v659_v34 = vadd.f32 %v658_v29, %v360_v30 }
 0x151   : > { %v719_v39 = vmax.f32 %v657_v32, 0.0 }
 0x152   : > { %v662_v35 = vpop.f32.mrb[18].mxu0  ;;  %1339 = vmatprep.subr.bf16.mxu1 %v1338_v31  ;;  %v720_v41 = vmax.f32 %v659_v34, 0.0  ;;  %v735_v34 = vld [vmem:[%s1897_s2] sm:$0xff] }
 0x153   : > { %v663_v36 = vadd.f32 %v662_v35, %v365_v33  ;;  %v664_v37 = vpop.f32.mrb[19].mxu0  ;;  %1341 = vmatpush1.bf16.msra.mxu1 %v1340_v28  ;;  %v736_v35 = vld [vmem:[%s1897_s2 + $0x8] sm:$0xff] }
 0x154   : > { %v665_v38 = vadd.f32 %v664_v37, %v365_v33  ;;  %v738_v37 = vld [vmem:[%s1897_s2 + $0x18] sm:$0xff] }
 0x155   : > { %v721_v40 = vmax.f32 %v663_v36, 0.0  ;;  %v737_v36 = vld [vmem:[%s1897_s2 + $0x10] sm:$0xff] }
 0x156   : > { %v722_v42 = vmax.f32 %v665_v38, 0.0  ;;  %v668_v43 = vpop.f32.mrb[20].mxu0  ;;  %v1492_v38 = vmov 2  }
 0x157   : > { %v1344_v44 = vpack.c.bf16 %v721_v40, %v719_v39  ;;  %v670_v45 = vpop.f32.mrb[21].mxu0  ;;  %v669_v48 = vadd.f32 %v668_v43, %v370_v46  ;;  %1422 = vset.pattern.permute.xlu1 %v1492_v38  ;;  %1423 = vset.pattern.permute.xlu0 %v1492_v38  ;;  %v741_v39 = vpop.permute.xlu0 %740 }
 0x158   : > { %v1342_v47 = vpack.c.bf16 %v722_v42, %v720_v41  ;;  %v671_v50 = vadd.f32 %v670_v45, %v370_v46  ;;  %857 = vperm.xlu1 %1422, %v1600_v2   ;;  %861 = vperm.xlu0 %1423, %v1618_v14   ;;  %v745_v42 = vpop.permute.xlu1 %744 }
 0x159   : > { %v723_v55 = vmax.f32 %v669_v48, 0.0 }
 0x15a   : > { %v674_v51 = vpop.f32.mrb[22].mxu0  ;;  %1343 = vmatprep.subr.bf16.mxu1 %v1342_v47  ;;  %v724_v57 = vmax.f32 %v671_v50, 0.0 }
 0x15b   : > { %v675_v52 = vadd.f32 %v674_v51, %v375_v49  ;;  %v676_v53 = vpop.f32.mrb[23].mxu0  ;;  %1345 = vmatpush1.bf16.msra.mxu1 %v1344_v44 }
 0x15c   : > { %v677_v54 = vadd.f32 %v676_v53, %v375_v49  ;;  %865 = vperm.xlu1 %1422, %v1605_v3  }
 0x15d   : > { %v725_v56 = vmax.f32 %v675_v52, 0.0  ;;  %v749_v52 = vpop.permute.xlu1 %748 }
 0x15e   : > { %v726_v58 = vmax.f32 %v677_v54, 0.0  ;;  %v680_v59 = vpop.f32.mrb[24].mxu0 }
 0x15f   : > { %v1348_v60 = vpack.c.bf16 %v725_v56, %v723_v55  ;;  %v682_v61 = vpop.f32.mrb[25].mxu0  ;;  %v681_v4 = vadd.f32 %v680_v59, %v380_v62  ;;  %v753_v56 = vpop.permute.xlu0 %752 }
 0x160   : > { %v1346_v63 = vpack.c.bf16 %v726_v58, %v724_v57  ;;  %v683_v6 = vadd.f32 %v682_v61, %v380_v62  ;;  %869 = vperm.xlu1 %1422, %v1634_v21  }
 0x161   : > { %v727_v9 = vmax.f32 %v681_v4, 0.0 }
 0x162   : > { %v686_v7 = vpop.f32.mrb[26].mxu0  ;;  %1347 = vmatprep.subr.bf16.mxu1 %v1346_v63  ;;  %v728_v11 = vmax.f32 %v683_v6, 0.0 }
 0x163   : > { %v687_v8 = vadd.f32 %v686_v7, %v385_v5  ;;  %v688_v1 = vpop.f32.mrb[27].mxu0  ;;  %1349 = vmatpush1.bf16.msra.mxu1 %v1348_v60 }
 0x164   : > { %v689_v0 = vadd.f32 %v688_v1, %v385_v5  ;;  %v853_v1 = vld [vmem:[%s1898_s3 + $0x8] sm:$0xff] }
 0x165   : > { %v729_v10 = vmax.f32 %v687_v8, 0.0  ;;  %v852_v8 = vld [vmem:[%s1898_s3] sm:$0xff] }
 0x166   : > { %v730_v12 = vmax.f32 %v689_v0, 0.0  ;;  %v692_v13 = vpop.f32.mrb[28].mxu0  ;;  %v854_v0 = vld [vmem:[%s1898_s3 + $0x10] sm:$0xff] }
 0x167   : > { %v1352_v15 = vpack.c.bf16 %v729_v10, %v727_v9  ;;  %v694_v16 = vpop.f32.mrb[29].mxu0  ;;  %v693_v19 = vadd.f32 %v692_v13, %v390_v17  ;;  %v855_v9 = vld [vmem:[%s1898_s3 + $0x18] sm:$0xff]  ;;  %v1493_v10 = vmov 3  }
 0x168   : > { %v1350_v18 = vpack.c.bf16 %v730_v12, %v728_v11  ;;  %v695_v23 = vadd.f32 %v694_v16, %v390_v17  ;;  %1424 = vset.pattern.permute.xlu0 %v1493_v10 }
 0x169   : > { %v731_v28 = vmax.f32 %v693_v19, 0.0  ;;  %984 = vperm.xlu0 %1424, %v1600_v2  }
 0x16a   : > { %v698_v24 = vpop.f32.mrb[30].mxu0  ;;  %1351 = vmatprep.subr.bf16.mxu1 %v1350_v18  ;;  %v732_v30 = vmax.f32 %v695_v23, 0.0 }
 0x16b   : > { %v699_v25 = vadd.f32 %v698_v24, %v395_v20  ;;  %v700_v26 = vpop.f32.mrb[31].mxu0  ;;  %1353 = vmatpush1.bf16.msra.mxu1 %v1352_v15 }
 0x16c   : > { %v701_v27 = vadd.f32 %v700_v26, %v395_v20 }
 0x16d   : > { %v733_v29 = vmax.f32 %v699_v25, 0.0 }
 0x16e   : > { %v734_v31 = vmax.f32 %v701_v27, 0.0 }
 0x16f   : > { %v1356_v32 = vpack.c.bf16 %v733_v29, %v731_v28 }
 0x170   : > { %v1354_v33 = vpack.c.bf16 %v734_v31, %v732_v30 }
 0x172   : > { %1355 = vmatprep.subr.bf16.mxu1 %v1354_v33 }
 0x173   : > { %1357 = vmatpush1.bf16.msra.mxu1 %v1356_v32 }
 0x176   : > { %820 = vmatmul.mubr.f32.vlgmr.msra.gmra.mrb[0].mxu1 %v735_v34 }
 0x177   : > { %825 = vmatprep.mubr.f32.mxu1 %v1490_v22 }
 0x17a   : > { %826 = vmatmul.mubr.f32.gmra.mrb[2].mxu1 %v736_v35 }
 0x17b   : > { %831 = vmatprep.mubr.f32.mxu1 %v1490_v22 }
 0x17e   : > { %832 = vmatmul.mubr.f32.gmra.mrb[4].mxu1 %v737_v36 }
 0x17f   : > { %837 = vmatprep.mubr.f32.mxu1 %v1490_v22 }
 0x182   : > { %838 = vmatmul.mubr.f32.gmra.mrb[6].mxu1 %v738_v37 }
 0x183   : > { %949 = vmatprep.mubr.f32.mxu1 %v1490_v22 }
 0x1d7   : > { %v858_v11 = vpop.permute.xlu1 %857  ;;  %v862_v15 = vpop.permute.xlu0 %861 }
 0x1db   : > { %v866_v23 = vpop.permute.xlu1 %865 }
 0x1df   : > { %v870_v32 = vpop.permute.xlu1 %869 }
 0x249   : > { %v821_v40 = vpop.f32.mrb[0].mxu1 }
 0x24a   : > { %v823_v41 = vpop.f32.mrb[1].mxu1  ;;  %v822_v43 = vadd.f32 %v821_v40, %v741_v39 }
 0x24b   : > { %v824_v44 = vadd.f32 %v823_v41, %v741_v39 }
 0x24c   : > { %v844_v49 = vmax.f32 %v822_v43, 0.0 }
 0x24d   : > { %v827_v45 = vpop.f32.mrb[2].mxu1  ;;  %v845_v51 = vmax.f32 %v824_v44, 0.0  ;;  %v982_v44 = vld [vmem:[%s1899_s4] sm:$0x3] }
 0x24e   : > { %v828_v46 = vadd.f32 %v827_v45, %v745_v42  ;;  %v829_v47 = vpop.f32.mrb[3].mxu1  ;;  %v985_v45 = vpop.permute.xlu0 %984 }
 0x24f   : > { %v830_v48 = vadd.f32 %v829_v47, %v745_v42 }
 0x250   : > { %v846_v50 = vmax.f32 %v828_v46, 0.0 }
 0x251   : > { %v847_v53 = vmax.f32 %v830_v48, 0.0  ;;  %v833_v14 = vpop.f32.mrb[4].mxu1 }
 0x252   : > { %v1360_v54 = vpack.c.bf16 %v846_v50, %v844_v49  ;;  %v835_v3 = vpop.f32.mrb[5].mxu1  ;;  %v834_v21 = vadd.f32 %v833_v14, %v749_v52 }
 0x253   : > { %v1358_v55 = vpack.c.bf16 %v847_v53, %v845_v51  ;;  %v836_v57 = vadd.f32 %v835_v3, %v749_v52 }
 0x254   : > { %v848_v62 = vmax.f32 %v834_v21, 0.0 }
 0x255   : > { %v839_v58 = vpop.f32.mrb[6].mxu1  ;;  %1359 = vmatprep.subr.bf16.mxu1 %v1358_v55  ;;  %v849_v4 = vmax.f32 %v836_v57, 0.0 }
 0x256   : > { %v840_v59 = vadd.f32 %v839_v58, %v753_v56  ;;  %v841_v60 = vpop.f32.mrb[7].mxu1  ;;  %1361 = vmatpush1.bf16.msra.mxu1 %v1360_v54 }
 0x257   : > { %v842_v61 = vadd.f32 %v841_v60, %v753_v56 }
 0x258   : > { %v850_v63 = vmax.f32 %v840_v59, 0.0 }
 0x259   : > { %v851_v5 = vmax.f32 %v842_v61, 0.0 }
 0x25a   : > { %v1364_v6 = vpack.c.bf16 %v850_v63, %v848_v62 }
 0x25b   : > { %v1362_v7 = vpack.c.bf16 %v851_v5, %v849_v4 }
 0x25d   : > { %1363 = vmatprep.subr.bf16.mxu1 %v1362_v7 }
 0x25e   : > { %1365 = vmatpush1.bf16.msra.mxu1 %v1364_v6 }
 0x261   : > { %1202 = vmatmul.mubr.msk.f32.vlgmr.msra.gmra.mrb[8].mxu1 %vm872_vm2, %v852_v8 }
 0x262   : > { %955 = vmatprep.mubr.f32.mxu1 %v1490_v22 }
 0x265   : > { %1203 = vmatmul.mubr.msk.f32.gmra.mrb[10].mxu1 %vm872_vm2, %v853_v1 }
 0x266   : > { %961 = vmatprep.mubr.f32.mxu1 %v1490_v22 }
 0x269   : > { %1204 = vmatmul.mubr.msk.f32.gmra.mrb[12].mxu1 %vm872_vm2, %v854_v0 }
 0x26a   : > { %967 = vmatprep.mubr.f32.mxu1 %v1490_v22 }
 0x26d   : > { %1205 = vmatmul.mubr.msk.f32.gmra.mrb[14].mxu1 %vm872_vm2, %v855_v9 }
 0x26e   : > { %1054 = vmatprep.mubr.f32.mxu1 %v1490_v22 }
 0x334   : > { %v951_v12 = vpop.f32.mrb[8].mxu1 }
 0x335   : > { %v953_v13 = vpop.f32.mrb[9].mxu1  ;;  %v952_v16 = vadd.f32 %v951_v12, %v858_v11 }
 0x336   : > { %v954_v17 = vadd.f32 %v953_v13, %v858_v11 }
 0x337   : > { %v974_v25 = vmax.f32 %v952_v16, 0.0 }
 0x338   : > { %v957_v18 = vpop.f32.mrb[10].mxu1  ;;  %v975_v27 = vmax.f32 %v954_v17, 0.0 }
 0x339   : > { %v958_v19 = vadd.f32 %v957_v18, %v862_v15  ;;  %v959_v20 = vpop.f32.mrb[11].mxu1 }
 0x33a   : > { %v960_v24 = vadd.f32 %v959_v20, %v862_v15 }
 0x33b   : > { %v976_v26 = vmax.f32 %v958_v19, 0.0 }
 0x33c   : > { %v977_v28 = vmax.f32 %v960_v24, 0.0  ;;  %v963_v22 = vpop.f32.mrb[12].mxu1 }
 0x33d   : > { %v1368_v29 = vpack.c.bf16 %v976_v26, %v974_v25  ;;  %v965_v30 = vpop.f32.mrb[13].mxu1  ;;  %v964_v2 = vadd.f32 %v963_v22, %v866_v23 }
 0x33e   : > { %v1366_v31 = vpack.c.bf16 %v977_v28, %v975_v27  ;;  %v966_v33 = vadd.f32 %v965_v30, %v866_v23 }
 0x33f   : > { %v978_v38 = vmax.f32 %v964_v2, 0.0 }
 0x340   : > { %v969_v34 = vpop.f32.mrb[14].mxu1  ;;  %1367 = vmatprep.subr.bf16.mxu1 %v1366_v31  ;;  %v979_v40 = vmax.f32 %v966_v33, 0.0 }
 0x341   : > { %v970_v35 = vadd.f32 %v969_v34, %v870_v32  ;;  %v971_v36 = vpop.f32.mrb[15].mxu1  ;;  %1369 = vmatpush1.bf16.msra.mxu1 %v1368_v29 }
 0x342   : > { %v972_v37 = vadd.f32 %v971_v36, %v870_v32 }
 0x343   : > { %v980_v39 = vmax.f32 %v970_v35, 0.0 }
 0x344   : > { %v981_v41 = vmax.f32 %v972_v37, 0.0 }
 0x345   : > { %v1372_v42 = vpack.c.bf16 %v980_v39, %v978_v38 }
 0x346   : > { %v1370_v43 = vpack.c.bf16 %v981_v41, %v979_v40 }
 0x348   : > { %1371 = vmatprep.subr.bf16.mxu1 %v1370_v43 }
 0x349   : > { %1373 = vmatpush1.bf16.msra.mxu1 %v1372_v42 }
 0x34c   : > { %1206 = vmatmul.mubr.msk.f32.vlgmr.msra.gmra.mrb[16].mxu1 %vm872_vm2, %v982_v44 }
 0x41f   : > { %v1056_v46 = vpop.f32.mrb[16].mxu1 }
 0x420   : > { %v1057_v47 = vadd.f32 %v1056_v46, %v985_v45  ;;  %v1058_v48 = vpop.f32.mrb[17].mxu1 }
 0x421   : > { %v1059_v49 = vadd.f32 %v1058_v48, %v985_v45 }
 0x423   : > { %v1063_v50 = vcombine.low %v1057_v47, %v1059_v49 }
 0x425   : > { %1207 = vst.sshfl [vmem:[%s245_s10] sm:$0x33 pattern:$0x76325410] %v1063_v50 }
 0x426   : > { %1438 = shalt.err (!%p1435_p3)
}
 0x427   : > { %s1439_s20 = scalar_lea.hbm %s1853_s14, 64  ;;  %s1443_s29 = scalar_lea.hbm %s1901_s6, 128 }
 0x428   : > { %p1440_p4 = scmp.ne.s32.totalorder %s1853_s14, %s1439_s20  ;;  %p1444_p9 = scmp.lt.u32.totalorder %s1853_s14, %s1901_s6 }
 0x429   : > { %p1445_p10 = scmp.lt.u32.totalorder %s1443_s29, %s1439_s20  ;;  %p1447_p12 = scmp.lt.u32.totalorder %s1439_s20, %s1853_s14 }
 0x42a   : > { %p1441_p7 = pnand %p1440_p4, %p1568_p5 }
 0x42b   : > { %p1446_p11 = por %p1445_p10, %p1444_p9 }
 0x42c   : > { %p1442_p8 = pneg %p1441_p7 }
 0x42d   : > { %p1448_p13 = por %p1447_p12, %p1446_p11 }
 0x42f   : > { %p1449_p0 = pnand %p1448_p13, %p1442_p8 }
 0x431   : > { %1452 = shalt.err (!%p1449_p0)
}
 0x432   : > { %1374 = dma.vmem_to_hbm [thread:$0]  (%p1568_p5), %s1855_s11, 64, %s1853_s14, %s1074_s16  }
 0x433 PF: > { %p1380_p1 = scmp.ge.s32.totalorder %s1487_s24, 2  ;;  %s1100_s10 = sand.u32 1, %s1475_s21  }
 0x434   : > { %s1101_s12 = scalar_lea.sflag [#allocation3], %s1100_s10 }
 0x435   : > { %p1377_p2 = pnand %p1380_p1, %p1572_p6 }
 0x437   : > { %1470 = dma.done.wait (!%p1377_p2), %s1101_s12, 64  }
 0x438   : > { %1472 = vsyncadd (!%p1377_p2), %s1101_s12, 4294967232  ;;  %p16_p3 = scmp.ge.s32.totalorder %s1555_s27, 4   ;;  %s1906_s21 = smov %s1479_s22 }
 0x439   : > { %s1907_s22 = smov %s1483_s23  ;;  %s1908_s23 = smov %s1566_s30 }
 0x43a   : > { %s1909_s24 = smov %s1555_s27  ;;  %18 = sbr.rel (!%p16_p3) target bundleno = 3 (0x3), region = 79 }
 0x441   :  { %1106 = vsyncpa [#allocation3], 1 }
 0x442   :  { %1108 = vsyncpa [#allocation3 + $0x1], 1 }

</bundles_post_ra>
